<compile_context>
chip_gen: v5e
topology: v5e:2x2
jax: 0.10.0
libtpu: 0.0.40
codegen_flags: <defaults>
</compile_context>

<pallas_src>
import jax
import jax.numpy as jnp
from jax.experimental import pallas as pl
from jax.experimental.pallas import tpu as pltpu

LANE = 128


def _round_up(x, m):
    return ((x + m - 1) // m) * m


def _device_kind():
    try:
        return jax.devices()[0].device_kind.lower()
    except Exception:
        return ""


def _tpu_vmem_capacity_bytes():
    try:
        return int(pltpu.get_tpu_info().vmem_capacity_bytes)
    except Exception:
        # Conservative fallback: 64 MiB per TC on v7x, 128 MiB elsewhere.
        return (64 << 20) if "v7" in _device_kind() else (128 << 20)


def _make_classifier_kernel(n_chunks, chunk):
    """Kernel body; n_chunks/chunk are static (chunk * n_chunks == hid_p)."""

    def kernel(x_ref, w1_ref, b1_ref, w2_ref, b2_ref, o_ref):
        x = x_ref[...]
        if n_chunks == 1:
            # [TB, IN] @ [IN, H] -> f32; bias; Dropout(eval)=identity; ReLU (VPU).
            h = jnp.dot(x, w1_ref[...], preferred_element_type=jnp.float32)
            h = jnp.maximum(h + b1_ref[...], 0.0)
            # [TB, H] @ [H, L] -> f32 accumulation (operands may be bf16).
            out = jnp.dot(h.astype(w2_ref.dtype), w2_ref[...],
                          preferred_element_type=jnp.float32)
            o_ref[...] = (out + b2_ref[...]).astype(o_ref.dtype)
        else:
            # Chunk the hidden dim: bounds the f32 intermediate to [TB, chunk]
            # and accumulates the second matmul into a [TB, L] f32 accumulator.
            acc = jnp.zeros((x.shape[0], o_ref.shape[-1]), jnp.float32)
            for c in range(n_chunks):  # static unroll; slices are views
                lo, hi = c * chunk, (c + 1) * chunk
                h = jnp.dot(x, w1_ref[:, lo:hi],
                            preferred_element_type=jnp.float32)
                h = jnp.maximum(h + b1_ref[:, lo:hi], 0.0)
                acc = acc + jnp.dot(h.astype(w2_ref.dtype), w2_ref[lo:hi, :],
                                    preferred_element_type=jnp.float32)
            o_ref[...] = (acc + b2_ref[...]).astype(o_ref.dtype)

    return kernel


def prepare_classifier_params(w1, b1, w2, b2, *, compute_dtype=jnp.float32):
    """One-time parameter prep (hoisted out of the hot path).

    Zero-pads feature dims to lane (128) multiples -> lane-dense tiles, unmasked
    stores, full MXU width -- padding is mathematically exact.  Casts weights to
    compute_dtype (e.g. bf16 for the high-throughput MXU path); biases stay f32.
    """
    in_size, hidden = w1.shape
    hidden2, num_labels = w2.shape
    assert hidden == hidden2 and b1.shape == (hidden,) and b2.shape == (num_labels,)
    in_p = _round_up(in_size, LANE)
    hid_p = _round_up(hidden, LANE)
    lab_p = _round_up(num_labels, LANE)
    w1_p = jnp.pad(w1, ((0, in_p - in_size), (0, hid_p - hidden))).astype(compute_dtype)
    w2_p = jnp.pad(w2, ((0, hid_p - hidden), (0, lab_p - num_labels))).astype(compute_dtype)
    b1_p = jnp.pad(b1.reshape(1, -1), ((0, 0), (0, hid_p - hidden))).astype(jnp.float32)
    b2_p = jnp.pad(b2.reshape(1, -1), ((0, 0), (0, lab_p - num_labels))).astype(jnp.float32)
    return {
        "w1": w1_p, "b1": b1_p, "w2": w2_p, "b2": b2_p,
        "in_size": in_size, "hidden": hidden, "num_labels": num_labels,
        "compute_dtype": jnp.dtype(compute_dtype),
    }


def classifier_forward(x, params, *, tile_b=None, hidden_chunk=None):
    """Hot path: y[B, num_labels] = relu(x @ W1 + b1) @ W2 + b2 (eval-mode dropout)."""
    B, in_size = x.shape
    assert in_size == params["in_size"]
    w1_p, b1_p = params["w1"], params["b1"]
    w2_p, b2_p = params["w2"], params["b2"]
    compute_dtype = params["compute_dtype"]
    num_labels = params["num_labels"]
    in_p, hid_p = w1_p.shape
    lab_p = w2_p.shape[1]
    out_dtype = x.dtype

    kind = _device_kind()
    is_v7 = "v7" in kind

    # --- Batch tile selection -------------------------------------------------
    # Large tiles amortize the ~0.35 us per-grid-step overhead on v5*/v6e (128 MiB
    # VMEM, weights resident); stay at 256 on v7x where 64 MiB/TC is tight.
    if tile_b is None:
        tile_b = 256 if is_v7 else 512
    tile_b = max(16, _round_up(tile_b, 16))
    if is_v7 and 128 < B <= tile_b:
        # 2 TensorCores per v7x chip: split moderate batches so both get a block.
        tile_b = max(16, _round_up((B + 1) // 2, 16))
    if B <= tile_b:
        # Single full-extent block along batch: no ragged tail, no padding.
        tile_b = B

    # --- Hidden-dim chunking ----------------------------------------------------
    if hidden_chunk is None:
        hidden_chunk = hid_p if hid_p <= 2048 else 1024
    hidden_chunk = max(LANE, (min(hidden_chunk, hid_p) // LANE) * LANE)
    while hid_p % hidden_chunk != 0:
        hidden_chunk -= LANE
    n_chunks = hid_p // hidden_chunk

    # --- x: only pad/cast when required (never the batch dim) -------------------
    if in_p != in_size or x.dtype != compute_dtype:
        x_in = jnp.pad(x, ((0, 0), (0, in_p - in_size))).astype(compute_dtype)
    else:
        x_in = x

    grid = (pl.cdiv(B, tile_b),)

    cbytes = jnp.dtype(compute_dtype).itemsize
    obytes = jnp.dtype(out_dtype).itemsize
    phys_vmem = _tpu_vmem_capacity_bytes()

    cost = pl.CostEstimate(
        flops=2 * B * (in_p * hid_p + hid_p * lab_p),
        transcendentals=0,
        bytes_accessed=(B * in_p * cbytes
                        + (in_p * hid_p + hid_p * lab_p) * cbytes
                        + (hid_p + lab_p) * 4
                        + B * lab_p * obytes),
    )

    def _run(single_buffer_weights):
        weight_kwargs = (
            {"pipeline_mode": pl.Buffered(1)} if single_buffer_weights else {}
        )
        weight_buf = 1 if single_buffer_weights else 2
        # VMEM footprint: x/out tiles double-buffered, weights/biases
        # (single- or double-) buffered, f32 chunk intermediate + accumulator.
        vmem_est = (
            2 * tile_b * in_p * cbytes
            + 2 * tile_b * lab_p * obytes
            + weight_buf * (in_p * hid_p + hid_p * lab_p) * cbytes
            + weight_buf * (hid_p + lab_p) * 4
            + tile_b * hidden_chunk * 4
            + tile_b * lab_p * 4
        )
        vmem_limit = min(int(0.9 * phys_vmem), max(32 << 20, int(vmem_est * 1.5)))

        return pl.pallas_call(
            _make_classifier_kernel(n_chunks, hidden_chunk),
            out_shape=jax.ShapeDtypeStruct((B, lab_p), out_dtype),
            grid_spec=pltpu.PrefetchScalarGridSpec(
                num_scalar_prefetch=0,
                grid=grid,
                in_specs=[
                    pl.BlockSpec((tile_b, in_p), lambda i: (i, 0)),     # x tile
                    pl.BlockSpec((in_p, hid_p), lambda i: (0, 0),
                                 **weight_kwargs),                      # W1 (resident)
                    pl.BlockSpec((1, hid_p), lambda i: (0, 0),
                                 **weight_kwargs),                      # b1 (f32)
                    pl.BlockSpec((hid_p, lab_p), lambda i: (0, 0),
                                 **weight_kwargs),                      # W2 (resident)
                    pl.BlockSpec((1, lab_p), lambda i: (0, 0),
                                 **weight_kwargs),                      # b2 (f32)
                ],
                out_specs=pl.BlockSpec((tile_b, lab_p), lambda i: (i, 0)),
            ),
            compiler_params=pltpu.CompilerParams(
                dimension_semantics=("parallel",),
                vmem_limit_bytes=vmem_limit,
            ),
            cost_estimate=cost,
        )(x_in, w1_p, b1_p, w2_p, b2_p)

    try:
        out = _run(single_buffer_weights=True)
    except Exception:
        # Fallback for JAX builds without BlockSpec pipeline_mode / Buffered(1).
        out = _run(single_buffer_weights=False)

    return out if lab_p == num_labels else out[:, :num_labels]


def _torch_like_linear_init(key, fan_in, shape):
    bound = 1.0 / (fan_in ** 0.5)
    return jax.random.uniform(key, shape, jnp.float32, minval=-bound, maxval=bound)


if __name__ == "__main__":
    key = jax.random.PRNGKey(0)

    # ---- Test 1 & 2: small shapes matching the module's forward ----------------
    batch, in_size, hidden_size, num_labels = 8, 32, 64, 8
    kx, kw1, kb1, kw2, kb2, kx2, kw3, kb3, kw4, kb4 = jax.random.split(key, 10)

    x = jax.random.normal(kx, (batch, in_size), dtype=jnp.float32)
    w1 = _torch_like_linear_init(kw1, in_size, (in_size, hidden_size))
    b1 = _torch_like_linear_init(kb1, in_size, (hidden_size,))
    w2 = _torch_like_linear_init(kw2, hidden_size, (hidden_size, num_labels))
    b2 = _torch_like_linear_init(kb2, hidden_size, (num_labels,))

    ref = jnp.maximum(x @ w1 + b1, 0.0) @ w2 + b2  # dropout = identity (eval)

    # f32 compute path (one-time param prep, then hot-path forward).
    params_f32 = prepare_classifier_params(w1, b1, w2, b2, compute_dtype=jnp.float32)
    out = jax.block_until_ready(classifier_forward(x, params_f32))
    assert out.shape == (batch, num_labels)
    assert jnp.allclose(out, ref, atol=1e-5, rtol=1e-5)

    # bf16 matmul operands, f32 accumulation (precision trade-off vs. f32 reference).
    params_bf16 = prepare_classifier_params(w1, b1, w2, b2, compute_dtype=jnp.bfloat16)
    out_bf16 = jax.block_until_ready(classifier_forward(x, params_bf16))
    assert out_bf16.shape == (batch, num_labels)
    assert jnp.allclose(out_bf16.astype(jnp.float32), ref, atol=5e-2, rtol=5e-2)

    # ---- Test 3: ragged batch tail + hidden-chunked kernel path ----------------
    b3, in3, hid3, lab3 = 20, 128, 256, 10
    x3 = jax.random.normal(kx2, (b3, in3), dtype=jnp.float32)
    w3 = _torch_like_linear_init(kw3, in3, (in3, hid3))
    bb3 = _torch_like_linear_init(kb3, in3, (hid3,))
    w4 = _torch_like_linear_init(kw4, hid3, (hid3, lab3))
    bb4 = _torch_like_linear_init(kb4, hid3, (lab3,))
    ref3 = jnp.maximum(x3 @ w3 + bb3, 0.0) @ w4 + bb4

    params3 = prepare_classifier_params(w3, bb3, w4, bb4, compute_dtype=jnp.float32)
    out3 = jax.block_until_ready(
        classifier_forward(x3, params3, hidden_chunk=128))
    assert out3.shape == (b3, lab3)
    assert jnp.allclose(out3, ref3, atol=1e-5, rtol=1e-5)

    print("KERNEL_OK")
</pallas_src>

<mosaic_0001>
module attributes {stable_mosaic.version = 11 : i64} {
  func.func @kernel(%arg0: i32, %arg1: memref<8x128xf32, #tpu.memory_space<vmem>>, %arg2: memref<128x128xf32, #tpu.memory_space<vmem>>, %arg3: memref<1x128xf32, #tpu.memory_space<vmem>>, %arg4: memref<128x128xf32, #tpu.memory_space<vmem>>, %arg5: memref<1x128xf32, #tpu.memory_space<vmem>>, %arg6: memref<8x128xf32, #tpu.memory_space<vmem>>) attributes {dimension_semantics = [#tpu.dimension_semantics<parallel>], iteration_bounds = array<i64: 1>, scalar_prefetch = 0 : i64, scratch_operands = 0 : i64, tpu.core_type = #tpu.core_type<tc>, window_params = [{transform_indices = @transform_0, window_bounds = array<i64: 8, 128>}, {pipeline_mode = #tpu.pipeline_mode<synchronous>, transform_indices = @transform_1, window_bounds = array<i64: 128, 128>}, {pipeline_mode = #tpu.pipeline_mode<synchronous>, transform_indices = @transform_2, window_bounds = array<i64: 1, 128>}, {pipeline_mode = #tpu.pipeline_mode<synchronous>, transform_indices = @transform_3, window_bounds = array<i64: 128, 128>}, {pipeline_mode = #tpu.pipeline_mode<synchronous>, transform_indices = @transform_4, window_bounds = array<i64: 1, 128>}, {transform_indices = @transform_5, window_bounds = array<i64: 8, 128>}]} {
    %c0 = arith.constant 0 : index
    %c0_0 = arith.constant 0 : index
    %0 = vector.load %arg1[%c0, %c0_0] : memref<8x128xf32, #tpu.memory_space<vmem>>, vector<8x128xf32>
    %c0_1 = arith.constant 0 : index
    %c0_2 = arith.constant 0 : index
    %1 = vector.load %arg2[%c0_1, %c0_2] : memref<128x128xf32, #tpu.memory_space<vmem>>, vector<128x128xf32>
    %cst = arith.constant dense<0.000000e+00> : vector<8x128xf32>
    %2 = tpu.matmul %0, %1, %cst {dimension_numbers = #tpu.dot_dimension_numbers<[1], [0], [0], [1], [0, 0, 1, 1], [], []>} : vector<8x128xf32>, vector<128x128xf32>, vector<8x128xf32> -> vector<8x128xf32>
    %c0_3 = arith.constant 0 : index
    %c0_4 = arith.constant 0 : index
    %3 = vector.load %arg3[%c0_3, %c0_4] : memref<1x128xf32, #tpu.memory_space<vmem>>, vector<1x128xf32>
    %4 = vector.broadcast %3 : vector<1x128xf32> to vector<8x128xf32>
    %5 = arith.addf %2, %4 : vector<8x128xf32>
    %cst_5 = arith.constant 0.000000e+00 : f32
    %6 = vector.broadcast %cst_5 : f32 to vector<8x128xf32>
    %7 = arith.maximumf %5, %6 : vector<8x128xf32>
    %c0_6 = arith.constant 0 : index
    %c0_7 = arith.constant 0 : index
    %8 = vector.load %arg4[%c0_6, %c0_7] : memref<128x128xf32, #tpu.memory_space<vmem>>, vector<128x128xf32>
    %cst_8 = arith.constant dense<0.000000e+00> : vector<8x128xf32>
    %9 = tpu.matmul %7, %8, %cst_8 {dimension_numbers = #tpu.dot_dimension_numbers<[1], [0], [0], [1], [0, 0, 1, 1], [], []>} : vector<8x128xf32>, vector<128x128xf32>, vector<8x128xf32> -> vector<8x128xf32>
    %c0_9 = arith.constant 0 : index
    %c0_10 = arith.constant 0 : index
    %10 = vector.load %arg5[%c0_9, %c0_10] : memref<1x128xf32, #tpu.memory_space<vmem>>, vector<1x128xf32>
    %11 = vector.broadcast %10 : vector<1x128xf32> to vector<8x128xf32>
    %12 = arith.addf %9, %11 : vector<8x128xf32>
    %c0_11 = arith.constant 0 : index
    %c0_12 = arith.constant 0 : index
    %13 = vector.load %arg6[%c0_11, %c0_12] : memref<8x128xf32, #tpu.memory_space<vmem>>, vector<8x128xf32>
    tpu.vector_store %arg6[%c0_11, %c0_12], %12 {strides = array<i32>} : memref<8x128xf32, #tpu.memory_space<vmem>>, vector<8x128xf32>,
    return
  }
  func.func @transform_0(%arg0: i32) -> (i32, i32) {
    %c0_i32 = arith.constant 0 : i32
    %c0_i32_0 = arith.constant 0 : i32
    return %arg0, %c0_i32 : i32, i32
  }
  func.func @transform_1(%arg0: i32) -> (i32, i32) {
    %c0_i32 = arith.constant 0 : i32
    %c0_i32_0 = arith.constant 0 : i32
    %c0_i32_1 = arith.constant 0 : i32
    return %c0_i32, %c0_i32_0 : i32, i32
  }
  func.func @transform_2(%arg0: i32) -> (i32, i32) {
    %c0_i32 = arith.constant 0 : i32
    %c0_i32_0 = arith.constant 0 : i32
    %c0_i32_1 = arith.constant 0 : i32
    return %c0_i32, %c0_i32_0 : i32, i32
  }
  func.func @transform_3(%arg0: i32) -> (i32, i32) {
    %c0_i32 = arith.constant 0 : i32
    %c0_i32_0 = arith.constant 0 : i32
    %c0_i32_1 = arith.constant 0 : i32
    return %c0_i32, %c0_i32_0 : i32, i32
  }
  func.func @transform_4(%arg0: i32) -> (i32, i32) {
    %c0_i32 = arith.constant 0 : i32
    %c0_i32_0 = arith.constant 0 : i32
    %c0_i32_1 = arith.constant 0 : i32
    return %c0_i32, %c0_i32_0 : i32, i32
  }
  func.func @transform_5(%arg0: i32) -> (i32, i32) {
    %c0_i32 = arith.constant 0 : i32
    %c0_i32_0 = arith.constant 0 : i32
    return %arg0, %c0_i32 : i32, i32
  }
}

module attributes {stable_mosaic.version = 11 : i64} {
  func.func @kernel(%arg0: i32, %arg1: memref<8x128xf32, #tpu.memory_space<vmem>>, %arg2: memref<128x128xf32, #tpu.memory_space<vmem>>, %arg3: memref<1x128xf32, #tpu.memory_space<vmem>>, %arg4: memref<128x128xf32, #tpu.memory_space<vmem>>, %arg5: memref<1x128xf32, #tpu.memory_space<vmem>>, %arg6: memref<8x128xf32, #tpu.memory_space<vmem>>) attributes {dimension_semantics = [#tpu.dimension_semantics<parallel>], iteration_bounds = array<i64: 1>, scalar_prefetch = 0 : i64, scratch_operands = 0 : i64, tpu.core_type = #tpu.core_type<tc>, window_params = [{transform_indices = @transform_0, window_bounds = array<i64: 8, 128>}, {pipeline_mode = #tpu.pipeline_mode<synchronous>, transform_indices = @transform_1, window_bounds = array<i64: 128, 128>}, {pipeline_mode = #tpu.pipeline_mode<synchronous>, transform_indices = @transform_2, window_bounds = array<i64: 1, 128>}, {pipeline_mode = #tpu.pipeline_mode<synchronous>, transform_indices = @transform_3, window_bounds = array<i64: 128, 128>}, {pipeline_mode = #tpu.pipeline_mode<synchronous>, transform_indices = @transform_4, window_bounds = array<i64: 1, 128>}, {transform_indices = @transform_5, window_bounds = array<i64: 8, 128>}]} {
    %c0 = arith.constant 0 : index
    %c0_0 = arith.constant 0 : index
    %0 = vector.load %arg1[%c0, %c0_0] : memref<8x128xf32, #tpu.memory_space<vmem>>, vector<8x128xf32>
    %c0_1 = arith.constant 0 : index
    %c0_2 = arith.constant 0 : index
    %1 = vector.load %arg2[%c0_1, %c0_2] : memref<128x128xf32, #tpu.memory_space<vmem>>, vector<128x128xf32>
    %cst = arith.constant dense<0.000000e+00> : vector<8x128xf32>
    %2 = tpu.matmul %0, %1, %cst {dimension_numbers = #tpu.dot_dimension_numbers<[1], [0], [0], [1], [0, 0, 1, 1], [], []>} : vector<8x128xf32>, vector<128x128xf32>, vector<8x128xf32> -> vector<8x128xf32>
    %c0_3 = arith.constant 0 : index
    %c0_4 = arith.constant 0 : index
    %3 = vector.load %arg3[%c0_3, %c0_4] : memref<1x128xf32, #tpu.memory_space<vmem>>, vector<1x128xf32>
    %4 = vector.broadcast %3 : vector<1x128xf32> to vector<8x128xf32>
    %5 = arith.addf %2, %4 : vector<8x128xf32>
    %cst_5 = arith.constant 0.000000e+00 : f32
    %6 = vector.broadcast %cst_5 : f32 to vector<8x128xf32>
    %7 = arith.maximumf %5, %6 : vector<8x128xf32>
    %c0_6 = arith.constant 0 : index
    %c0_7 = arith.constant 0 : index
    %8 = vector.load %arg4[%c0_6, %c0_7] : memref<128x128xf32, #tpu.memory_space<vmem>>, vector<128x128xf32>
    %cst_8 = arith.constant dense<0.000000e+00> : vector<8x128xf32>
    %9 = tpu.matmul %7, %8, %cst_8 {dimension_numbers = #tpu.dot_dimension_numbers<[1], [0], [0], [1], [0, 0, 1, 1], [], []>} : vector<8x128xf32>, vector<128x128xf32>, vector<8x128xf32> -> vector<8x128xf32>
    %c0_9 = arith.constant 0 : index
    %c0_10 = arith.constant 0 : index
    %10 = vector.load %arg5[%c0_9, %c0_10] : memref<1x128xf32, #tpu.memory_space<vmem>>, vector<1x128xf32>
    %11 = vector.broadcast %10 : vector<1x128xf32> to vector<8x128xf32>
    %12 = arith.addf %9, %11 : vector<8x128xf32>
    %c0_11 = arith.constant 0 : index
    %c0_12 = arith.constant 0 : index
    %13 = vector.load %arg6[%c0_11, %c0_12] : memref<8x128xf32, #tpu.memory_space<vmem>>, vector<8x128xf32>
    tpu.vector_store %arg6[%c0_11, %c0_12], %12 {strides = array<i32>} : memref<8x128xf32, #tpu.memory_space<vmem>>, vector<8x128xf32>,
    return
  }
  func.func @transform_0(%arg0: i32) -> (i32, i32) {
    %c0_i32 = arith.constant 0 : i32
    %c0_i32_0 = arith.constant 0 : i32
    return %arg0, %c0_i32 : i32, i32
  }
  func.func @transform_1(%arg0: i32) -> (i32, i32) {
    %c0_i32 = arith.constant 0 : i32
    %c0_i32_0 = arith.constant 0 : i32
    %c0_i32_1 = arith.constant 0 : i32
    return %c0_i32, %c0_i32_0 : i32, i32
  }
  func.func @transform_2(%arg0: i32) -> (i32, i32) {
    %c0_i32 = arith.constant 0 : i32
    %c0_i32_0 = arith.constant 0 : i32
    %c0_i32_1 = arith.constant 0 : i32
    return %c0_i32, %c0_i32_0 : i32, i32
  }
  func.func @transform_3(%arg0: i32) -> (i32, i32) {
    %c0_i32 = arith.constant 0 : i32
    %c0_i32_0 = arith.constant 0 : i32
    %c0_i32_1 = arith.constant 0 : i32
    return %c0_i32, %c0_i32_0 : i32, i32
  }
  func.func @transform_4(%arg0: i32) -> (i32, i32) {
    %c0_i32 = arith.constant 0 : i32
    %c0_i32_0 = arith.constant 0 : i32
    %c0_i32_1 = arith.constant 0 : i32
    return %c0_i32, %c0_i32_0 : i32, i32
  }
  func.func @transform_5(%arg0: i32) -> (i32, i32) {
    %c0_i32 = arith.constant 0 : i32
    %c0_i32_0 = arith.constant 0 : i32
    return %arg0, %c0_i32 : i32, i32
  }
}

</mosaic_0001>

<bundles_post_ra>
// kernel: tpu_custom_call.1
= control target key start
LH: loop header
LB: loop body
LE: loop exit
PB: predicated region body
PF: predicated region fallthrough
CT: control target
= control target key end

     0   :  { %10 = vsyncpa [#allocation3], 0  ;;  %s331_s0 = inlined_call_operand.hbm [shape: f32[8,128], index: 0, kind: input, shape index: {}]   ;;  %s332_s1 = inlined_call_operand.hbm [shape: f32[128,128], index: 1, kind: input, shape index: {}]   ;;  %s333_s2 = inlined_call_operand.vmem [shape: f32[1,128], index: 2, kind: input, shape index: {}]   ;;  %s334_s3 = inlined_call_operand.hbm [shape: f32[128,128], index: 3, kind: input, shape index: {}]   ;;  %s335_s4 = inlined_call_operand.vmem [shape: f32[1,128], index: 4, kind: input, shape index: {}]   ;;  %s336_s5 = inlined_call_operand.hbm [shape: f32[8,128], index: 5, kind: output, shape index: {}]  }
   0x1   :  { %11 = vsyncpa [#allocation6], 0  ;;  %s28_s20 = sshll.u32 %s332_s1, 4  ;;  %s29_s20 = int_to_ptr.hbm [resolvable:$true] %s28_s20 }
   0x2   :  { %12 = vsyncpa [#allocation4], 0  ;;  %s277_s21 = smov [#allocation5]   ;;  %s18_s25 = sshll.u32 %s331_s0, 4  ;;  %s19_s25 = int_to_ptr.hbm [resolvable:$true] %s18_s25 }
   0x3   :  { %s30_s22 = sshll.u32 %s277_s21, 4  ;;  %s278_s26 = smov 128   ;;  %s31_s22 = int_to_ptr.vmem [resolvable:$true] %s30_s22 }
   0x4   :  { %s279_s27 = smov 8   ;;  %s280_s28 = smov [#allocation2]  }
   0x5   :  { %36 = dma.hbm_to_vmem [thread:$0]  %s29_s20, 2048, %s31_s22, [#allocation6], %s278_s26, %s278_s26, %s279_s27  }
   0x6   :  { %s20_s29 = sshll.u32 %s280_s28, 4  ;;  %s43_s7 = sshll.u32 %s334_s3, 4  ;;  %s21_s29 = int_to_ptr.vmem [resolvable:$true] %s20_s29  ;;  %s44_s7 = int_to_ptr.hbm [resolvable:$true] %s43_s7 }
   0x7   :  { %23 = dma.hbm_to_vmem [thread:$0]  %s19_s25, 128, %s21_s29, [#allocation3]  }
   0x8   :  { %s281_s1 = smov [#allocation7]  }
   0x9   :  { %s45_s8 = sshll.u32 %s281_s1, 4  ;;  %s46_s8 = int_to_ptr.vmem [resolvable:$true] %s45_s8 }
   0xa   :  { %51 = dma.hbm_to_vmem [thread:$0]  %s44_s7, 2048, %s46_s8, [#allocation6], %s278_s26, %s278_s26, %s279_s27  }
   0xb   :  { %271 = dma.done.wait [#allocation3], 128  }
   0xc   :  { %272 = vsyncadd [#allocation3], 4294967168 }
   0xd   :  { %273 = dma.done.wait [#allocation6], 4096  }
   0xe   :  { %274 = vsyncadd [#allocation6], 4294963200  ;;  %v82_v0 = vld [vmem:[#allocation5 + $0x78] sm:$0xff]  ;;  %v81_v1 = vld [vmem:[#allocation5 + $0x70] sm:$0xff]  ;;  %s282_s11 = smov [#allocation8]   ;;  %s156_s15 = sshll.u32 %s336_s5, 4  ;;  %s157_s15 = int_to_ptr.hbm [resolvable:$true] %s156_s15 }
   0xf   :  { %87 = vmatpush.msra.mxu0 %v82_v0  ;;  %v80_v2 = vld [vmem:[#allocation5 + $0x68] sm:$0xff]  ;;  %v79_v3 = vld [vmem:[#allocation5 + $0x60] sm:$0xff]  ;;  %v123_v4 = vld [vmem:[#allocation7 + $0x78] sm:$0xff]  ;;  %s154_s12 = sshll.u32 %s282_s11, 4  ;;  %s155_s12 = int_to_ptr.vmem [resolvable:$true] %s154_s12 }
  0x10   :  { %v78_v5 = vld [vmem:[#allocation5 + $0x58] sm:$0xff]  ;;  %128 = vmatpush.msra.mxu1 %v123_v4  ;;  %v122_v6 = vld [vmem:[#allocation7 + $0x70] sm:$0xff]  ;;  %v121_v7 = vld [vmem:[#allocation7 + $0x68] sm:$0xff] }
  0x11   :  { %88 = vmatpush.msra.mxu0 %v81_v1  ;;  %v77_v8 = vld [vmem:[#allocation5 + $0x50] sm:$0xff]  ;;  %v120_v9 = vld [vmem:[#allocation7 + $0x60] sm:$0xff]  ;;  %v76_v10 = vld [vmem:[#allocation5 + $0x48] sm:$0xff] }
  0x12   :  { %129 = vmatpush.msra.mxu1 %v122_v6  ;;  %v119_v11 = vld [vmem:[#allocation7 + $0x58] sm:$0xff]  ;;  %v75_v12 = vld [vmem:[#allocation5 + $0x40] sm:$0xff]  ;;  %v118_v13 = vld [vmem:[#allocation7 + $0x50] sm:$0xff] }
  0x13   :  { %89 = vmatpush.msra.mxu0 %v80_v2  ;;  %v74_v14 = vld [vmem:[#allocation5 + $0x38] sm:$0xff]  ;;  %v117_v15 = vld [vmem:[#allocation7 + $0x48] sm:$0xff]  ;;  %v73_v16 = vld [vmem:[#allocation5 + $0x30] sm:$0xff] }
  0x14   :  { %130 = vmatpush.msra.mxu1 %v121_v7  ;;  %v116_v17 = vld [vmem:[#allocation7 + $0x40] sm:$0xff]  ;;  %v72_v18 = vld [vmem:[#allocation5 + $0x28] sm:$0xff]  ;;  %v115_v19 = vld [vmem:[#allocation7 + $0x38] sm:$0xff] }
  0x15   :  { %90 = vmatpush.msra.mxu0 %v79_v3  ;;  %v71_v20 = vld [vmem:[#allocation5 + $0x20] sm:$0xff]  ;;  %v114_v21 = vld [vmem:[#allocation7 + $0x30] sm:$0xff]  ;;  %v70_v22 = vld [vmem:[#allocation5 + $0x18] sm:$0xff] }
  0x16   :  { %131 = vmatpush.msra.mxu1 %v120_v9  ;;  %v113_v23 = vld [vmem:[#allocation7 + $0x28] sm:$0xff]  ;;  %v69_v24 = vld [vmem:[#allocation5 + $0x10] sm:$0xff]  ;;  %v112_v25 = vld [vmem:[#allocation7 + $0x20] sm:$0xff] }
  0x17   :  { %91 = vmatpush.msra.mxu0 %v78_v5  ;;  %v68_v26 = vld [vmem:[#allocation5 + $0x8] sm:$0xff]  ;;  %v111_v27 = vld [vmem:[#allocation7 + $0x18] sm:$0xff]  ;;  %v67_v28 = vld [vmem:[#allocation5] sm:$0xff] }
  0x18   :  { %132 = vmatpush.msra.mxu1 %v119_v11  ;;  %v66_v29 = vld [vmem:[#allocation2] sm:$0xff]  ;;  %v110_v30 = vld [vmem:[#allocation7 + $0x10] sm:$0xff]  ;;  %v109_v31 = vld [vmem:[#allocation7 + $0x8] sm:$0xff] }
  0x19   :  { %92 = vmatpush.msra.mxu0 %v77_v8  ;;  %v108_v32 = vld [vmem:[#allocation7] sm:$0xff]  ;;  %v173_v33 = vld [vmem:[%s333_s2] ss:$0 sm:$0xff] }
  0x1a   :  { %133 = vmatpush.msra.mxu1 %v118_v13  ;;  %v174_v37 = vld [vmem:[%s335_s4] ss:$0 sm:$0xff] }
  0x1b   :  { %93 = vmatpush.msra.mxu0 %v76_v10 }
  0x1c   :  { %134 = vmatpush.msra.mxu1 %v117_v15 }
  0x1d   :  { %94 = vmatpush.msra.mxu0 %v75_v12 }
  0x1e   :  { %135 = vmatpush.msra.mxu1 %v116_v17 }
  0x1f   :  { %95 = vmatpush.msra.mxu0 %v74_v14 }
  0x20   :  { %136 = vmatpush.msra.mxu1 %v115_v19 }
  0x21   :  { %96 = vmatpush.msra.mxu0 %v73_v16 }
  0x22   :  { %137 = vmatpush.msra.mxu1 %v114_v21 }
  0x23   :  { %97 = vmatpush.msra.mxu0 %v72_v18 }
  0x24   :  { %138 = vmatpush.msra.mxu1 %v113_v23 }
  0x25   :  { %98 = vmatpush.msra.mxu0 %v71_v20 }
  0x26   :  { %139 = vmatpush.msra.mxu1 %v112_v25 }
  0x27   :  { %99 = vmatpush.msra.mxu0 %v70_v22 }
  0x28   :  { %140 = vmatpush.msra.mxu1 %v111_v27 }
  0x29   :  { %100 = vmatpush.msra.mxu0 %v69_v24 }
  0x2a   :  { %141 = vmatpush.msra.mxu1 %v110_v30 }
  0x2b   :  { %101 = vmatpush.msra.mxu0 %v68_v26 }
  0x2c   :  { %142 = vmatpush.msra.mxu1 %v109_v31 }
  0x2d   :  { %102 = vmatpush.msra.mxu0 %v67_v28 }
  0x2e   :  { %103 = vmatmul.f32.vlgmr.msra.gmra.mxu0 %v66_v29  ;;  %143 = vmatpush.msra.mxu1 %v108_v32 }
  0xab   :  { %v104_v34 = vpop.f32.mrf.mxu0 }
  0xac   :  { %v105_v35 = vadd.f32 %v173_v33, %v104_v34 }
  0xae   :  { %v107_v36 = vmax.f32 %v105_v35, 0.0 }
  0xb0   :  { %144 = vmatmul.f32.vlgmr.msra.gmra.mxu1 %v107_v36 }
 0x12d   :  { %v145_v38 = vpop.f32.mrf.mxu1 }
 0x12e   :  { %v146_v39 = vadd.f32 %v174_v37, %v145_v38 }
 0x130   :  { %148 = vst [vmem:[#allocation8] sm:$0xff] %v146_v39 }
 0x131   :  { %159 = dma.vmem_to_hbm [thread:$0]  %s155_s12, 128, %s157_s15, [#allocation4]  }
 0x132   :  { %275 = dma.done.wait [#allocation4], 128  }
 0x133   :  { %276 = vsyncadd [#allocation4], 4294967168 }
 0x134   :  { %164 = vsyncpa [#allocation3], 1 }
 0x135   :  { %165 = vsyncpa [#allocation6], 1 }
 0x136   :  { %166 = vsyncpa [#allocation4], 1 }

// kernel: tpu_custom_call.1
= control target key start
LH: loop header
LB: loop body
LE: loop exit
PB: predicated region body
PF: predicated region fallthrough
CT: control target
= control target key end

     0   :  { %10 = vsyncpa [#allocation3], 0  ;;  %s331_s0 = inlined_call_operand.hbm [shape: f32[8,128], index: 0, kind: input, shape index: {}]   ;;  %s332_s1 = inlined_call_operand.hbm [shape: f32[128,128], index: 1, kind: input, shape index: {}]   ;;  %s333_s2 = inlined_call_operand.vmem [shape: f32[1,128], index: 2, kind: input, shape index: {}]   ;;  %s334_s3 = inlined_call_operand.hbm [shape: f32[128,128], index: 3, kind: input, shape index: {}]   ;;  %s335_s4 = inlined_call_operand.vmem [shape: f32[1,128], index: 4, kind: input, shape index: {}]   ;;  %s336_s5 = inlined_call_operand.hbm [shape: f32[8,128], index: 5, kind: output, shape index: {}]  }
   0x1   :  { %11 = vsyncpa [#allocation6], 0  ;;  %s28_s20 = sshll.u32 %s332_s1, 4  ;;  %s29_s20 = int_to_ptr.hbm [resolvable:$true] %s28_s20 }
   0x2   :  { %12 = vsyncpa [#allocation4], 0  ;;  %s277_s21 = smov [#allocation5]   ;;  %s18_s25 = sshll.u32 %s331_s0, 4  ;;  %s19_s25 = int_to_ptr.hbm [resolvable:$true] %s18_s25 }
   0x3   :  { %s30_s22 = sshll.u32 %s277_s21, 4  ;;  %s278_s26 = smov 128   ;;  %s31_s22 = int_to_ptr.vmem [resolvable:$true] %s30_s22 }
   0x4   :  { %s279_s27 = smov 8   ;;  %s280_s28 = smov [#allocation2]  }
   0x5   :  { %36 = dma.hbm_to_vmem [thread:$0]  %s29_s20, 2048, %s31_s22, [#allocation6], %s278_s26, %s278_s26, %s279_s27  }
   0x6   :  { %s20_s29 = sshll.u32 %s280_s28, 4  ;;  %s43_s7 = sshll.u32 %s334_s3, 4  ;;  %s21_s29 = int_to_ptr.vmem [resolvable:$true] %s20_s29  ;;  %s44_s7 = int_to_ptr.hbm [resolvable:$true] %s43_s7 }
   0x7   :  { %23 = dma.hbm_to_vmem [thread:$0]  %s19_s25, 128, %s21_s29, [#allocation3]  }
   0x8   :  { %s281_s1 = smov [#allocation7]  }
   0x9   :  { %s45_s8 = sshll.u32 %s281_s1, 4  ;;  %s46_s8 = int_to_ptr.vmem [resolvable:$true] %s45_s8 }
   0xa   :  { %51 = dma.hbm_to_vmem [thread:$0]  %s44_s7, 2048, %s46_s8, [#allocation6], %s278_s26, %s278_s26, %s279_s27  }
   0xb   :  { %271 = dma.done.wait [#allocation3], 128  }
   0xc   :  { %272 = vsyncadd [#allocation3], 4294967168 }
   0xd   :  { %273 = dma.done.wait [#allocation6], 4096  }
   0xe   :  { %274 = vsyncadd [#allocation6], 4294963200  ;;  %v82_v0 = vld [vmem:[#allocation5 + $0x78] sm:$0xff]  ;;  %v81_v1 = vld [vmem:[#allocation5 + $0x70] sm:$0xff]  ;;  %s282_s11 = smov [#allocation8]   ;;  %s156_s15 = sshll.u32 %s336_s5, 4  ;;  %s157_s15 = int_to_ptr.hbm [resolvable:$true] %s156_s15 }
   0xf   :  { %87 = vmatpush.msra.mxu0 %v82_v0  ;;  %v80_v2 = vld [vmem:[#allocation5 + $0x68] sm:$0xff]  ;;  %v79_v3 = vld [vmem:[#allocation5 + $0x60] sm:$0xff]  ;;  %v123_v4 = vld [vmem:[#allocation7 + $0x78] sm:$0xff]  ;;  %s154_s12 = sshll.u32 %s282_s11, 4  ;;  %s155_s12 = int_to_ptr.vmem [resolvable:$true] %s154_s12 }
  0x10   :  { %v78_v5 = vld [vmem:[#allocation5 + $0x58] sm:$0xff]  ;;  %128 = vmatpush.msra.mxu1 %v123_v4  ;;  %v122_v6 = vld [vmem:[#allocation7 + $0x70] sm:$0xff]  ;;  %v121_v7 = vld [vmem:[#allocation7 + $0x68] sm:$0xff] }
  0x11   :  { %88 = vmatpush.msra.mxu0 %v81_v1  ;;  %v77_v8 = vld [vmem:[#allocation5 + $0x50] sm:$0xff]  ;;  %v120_v9 = vld [vmem:[#allocation7 + $0x60] sm:$0xff]  ;;  %v76_v10 = vld [vmem:[#allocation5 + $0x48] sm:$0xff] }
  0x12   :  { %129 = vmatpush.msra.mxu1 %v122_v6  ;;  %v119_v11 = vld [vmem:[#allocation7 + $0x58] sm:$0xff]  ;;  %v75_v12 = vld [vmem:[#allocation5 + $0x40] sm:$0xff]  ;;  %v118_v13 = vld [vmem:[#allocation7 + $0x50] sm:$0xff] }
  0x13   :  { %89 = vmatpush.msra.mxu0 %v80_v2  ;;  %v74_v14 = vld [vmem:[#allocation5 + $0x38] sm:$0xff]  ;;  %v117_v15 = vld [vmem:[#allocation7 + $0x48] sm:$0xff]  ;;  %v73_v16 = vld [vmem:[#allocation5 + $0x30] sm:$0xff] }
  0x14   :  { %130 = vmatpush.msra.mxu1 %v121_v7  ;;  %v116_v17 = vld [vmem:[#allocation7 + $0x40] sm:$0xff]  ;;  %v72_v18 = vld [vmem:[#allocation5 + $0x28] sm:$0xff]  ;;  %v115_v19 = vld [vmem:[#allocation7 + $0x38] sm:$0xff] }
  0x15   :  { %90 = vmatpush.msra.mxu0 %v79_v3  ;;  %v71_v20 = vld [vmem:[#allocation5 + $0x20] sm:$0xff]  ;;  %v114_v21 = vld [vmem:[#allocation7 + $0x30] sm:$0xff]  ;;  %v70_v22 = vld [vmem:[#allocation5 + $0x18] sm:$0xff] }
  0x16   :  { %131 = vmatpush.msra.mxu1 %v120_v9  ;;  %v113_v23 = vld [vmem:[#allocation7 + $0x28] sm:$0xff]  ;;  %v69_v24 = vld [vmem:[#allocation5 + $0x10] sm:$0xff]  ;;  %v112_v25 = vld [vmem:[#allocation7 + $0x20] sm:$0xff] }
  0x17   :  { %91 = vmatpush.msra.mxu0 %v78_v5  ;;  %v68_v26 = vld [vmem:[#allocation5 + $0x8] sm:$0xff]  ;;  %v111_v27 = vld [vmem:[#allocation7 + $0x18] sm:$0xff]  ;;  %v67_v28 = vld [vmem:[#allocation5] sm:$0xff] }
  0x18   :  { %132 = vmatpush.msra.mxu1 %v119_v11  ;;  %v66_v29 = vld [vmem:[#allocation2] sm:$0xff]  ;;  %v110_v30 = vld [vmem:[#allocation7 + $0x10] sm:$0xff]  ;;  %v109_v31 = vld [vmem:[#allocation7 + $0x8] sm:$0xff] }
  0x19   :  { %92 = vmatpush.msra.mxu0 %v77_v8  ;;  %v108_v32 = vld [vmem:[#allocation7] sm:$0xff]  ;;  %v173_v33 = vld [vmem:[%s333_s2] ss:$0 sm:$0xff] }
  0x1a   :  { %133 = vmatpush.msra.mxu1 %v118_v13  ;;  %v174_v37 = vld [vmem:[%s335_s4] ss:$0 sm:$0xff] }
  0x1b   :  { %93 = vmatpush.msra.mxu0 %v76_v10 }
  0x1c   :  { %134 = vmatpush.msra.mxu1 %v117_v15 }
  0x1d   :  { %94 = vmatpush.msra.mxu0 %v75_v12 }
  0x1e   :  { %135 = vmatpush.msra.mxu1 %v116_v17 }
  0x1f   :  { %95 = vmatpush.msra.mxu0 %v74_v14 }
  0x20   :  { %136 = vmatpush.msra.mxu1 %v115_v19 }
  0x21   :  { %96 = vmatpush.msra.mxu0 %v73_v16 }
  0x22   :  { %137 = vmatpush.msra.mxu1 %v114_v21 }
  0x23   :  { %97 = vmatpush.msra.mxu0 %v72_v18 }
  0x24   :  { %138 = vmatpush.msra.mxu1 %v113_v23 }
  0x25   :  { %98 = vmatpush.msra.mxu0 %v71_v20 }
  0x26   :  { %139 = vmatpush.msra.mxu1 %v112_v25 }
  0x27   :  { %99 = vmatpush.msra.mxu0 %v70_v22 }
  0x28   :  { %140 = vmatpush.msra.mxu1 %v111_v27 }
  0x29   :  { %100 = vmatpush.msra.mxu0 %v69_v24 }
  0x2a   :  { %141 = vmatpush.msra.mxu1 %v110_v30 }
  0x2b   :  { %101 = vmatpush.msra.mxu0 %v68_v26 }
  0x2c   :  { %142 = vmatpush.msra.mxu1 %v109_v31 }
  0x2d   :  { %102 = vmatpush.msra.mxu0 %v67_v28 }
  0x2e   :  { %103 = vmatmul.f32.vlgmr.msra.gmra.mxu0 %v66_v29  ;;  %143 = vmatpush.msra.mxu1 %v108_v32 }
  0xab   :  { %v104_v34 = vpop.f32.mrf.mxu0 }
  0xac   :  { %v105_v35 = vadd.f32 %v173_v33, %v104_v34 }
  0xae   :  { %v107_v36 = vmax.f32 %v105_v35, 0.0 }
  0xb0   :  { %144 = vmatmul.f32.vlgmr.msra.gmra.mxu1 %v107_v36 }
 0x12d   :  { %v145_v38 = vpop.f32.mrf.mxu1 }
 0x12e   :  { %v146_v39 = vadd.f32 %v174_v37, %v145_v38 }
 0x130   :  { %148 = vst [vmem:[#allocation8] sm:$0xff] %v146_v39 }
 0x131   :  { %159 = dma.vmem_to_hbm [thread:$0]  %s155_s12, 128, %s157_s15, [#allocation4]  }
 0x132   :  { %275 = dma.done.wait [#allocation4], 128  }
 0x133   :  { %276 = vsyncadd [#allocation4], 4294967168 }
 0x134   :  { %164 = vsyncpa [#allocation3], 1 }
 0x135   :  { %165 = vsyncpa [#allocation6], 1 }
 0x136   :  { %166 = vsyncpa [#allocation4], 1 }

</bundles_post_ra>
